<compile_context>
chip_gen: v7x
topology: tpu7x:2x2x1
jax: 0.10.0
libtpu: 0.0.40
codegen_flags: <defaults>
</compile_context>

<pallas_src>
import functools

import jax
import jax.numpy as jnp
from jax.experimental import pallas as pl
from jax.experimental.pallas import tpu as pltpu

EPS = 1e-5
VMEM_LIMIT = 32 * 1024 * 1024  # portable across v5e/v6e/v7x scoped-VMEM limits


def _round_up(n, m=128):
    return ((n + m - 1) // m) * m


def _pick(dim, candidates):
    for c in candidates:
        if c <= dim and dim % c == 0:
            return c
    return dim


def _pad2(a, rows, cols):
    return jnp.pad(a, ((0, rows - a.shape[0]), (0, cols - a.shape[1])))


def fold_bn(bn):
    """Fold eval-mode BatchNorm into per-channel (scale, shift), 1-D."""
    gamma, beta, mean, var = bn
    scale = gamma / jnp.sqrt(var + EPS)
    shift = beta - mean * scale
    return scale, shift


def _pad_row(v, cols):
    return jnp.pad(v, (0, cols - v.shape[0]))[None, :].astype(jnp.float32)


# ----------------------------------------------------------------------------
# Kernel 1: tiled matmul + folded-BN affine (+ optional ReLU)   (conv1, 1x1)
# ----------------------------------------------------------------------------
def _matmul_bn_act_kernel(x_ref, w_ref, s_ref, t_ref, o_ref, acc_ref, *, relu):
    @pl.when(pl.program_id(2) == 0)
    def _():
        acc_ref[...] = jnp.zeros_like(acc_ref)

    acc_ref[...] += jnp.dot(x_ref[...], w_ref[...],
                            preferred_element_type=jnp.float32)

    @pl.when(pl.program_id(2) == pl.num_programs(2) - 1)
    def _():
        y = acc_ref[...] * s_ref[...] + t_ref[...]
        if relu:
            y = jnp.maximum(y, 0.0)
        o_ref[...] = y.astype(o_ref.dtype)


def matmul_bn_act(x, w, scale, shift, *, relu, out_dtype):
    M, K = x.shape
    N = w.shape[1]
    tm = _pick(M, (512, 256, 128, 64, 32, 16, 8))
    tn = _pick(N, (256, 128))
    tk = _pick(K, (512, 256, 128))
    flops = 2 * M * K * N
    bytes_accessed = int(M * K * x.dtype.itemsize + K * N * w.dtype.itemsize
                         + M * N * jnp.dtype(out_dtype).itemsize)
    return pl.pallas_call(
        functools.partial(_matmul_bn_act_kernel, relu=relu),
        out_shape=jax.ShapeDtypeStruct((M, N), out_dtype),
        grid=(M // tm, N // tn, K // tk),
        in_specs=[
            pl.BlockSpec((tm, tk), lambda i, j, k: (i, k)),
            pl.BlockSpec((tk, tn), lambda i, j, k: (k, j)),
            pl.BlockSpec((1, tn), lambda i, j, k: (0, j)),
            pl.BlockSpec((1, tn), lambda i, j, k: (0, j)),
        ],
        out_specs=pl.BlockSpec((tm, tn), lambda i, j, k: (i, j)),
        scratch_shapes=[pltpu.VMEM((tm, tn), jnp.float32)],
        compiler_params=pltpu.CompilerParams(
            dimension_semantics=("parallel", "parallel", "arbitrary"),
            vmem_limit_bytes=VMEM_LIMIT),
        cost_estimate=pl.CostEstimate(flops=flops, transcendentals=0,
                                      bytes_accessed=bytes_accessed),
    )(x, w, scale, shift)


# ----------------------------------------------------------------------------
# Kernel 2: 3x3 conv (stride 1, pad 1) + BN + ReLU, no materialized im2col.
# Input per batch is the H-padded image flattened to rows (plus one scalar-row
# pad on each end); each of the 9 taps is a row-offset slice + masked matmul.
# ----------------------------------------------------------------------------
def _conv3x3_bn_relu_kernel(x_ref, w_ref, s_ref, t_ref, o_ref, *, H, W):
    HW = H * W
    n = w_ref.shape[3]
    wcol = jax.lax.broadcasted_iota(jnp.int32, (HW, 1), 0) % W
    left_ok = wcol > 0           # tap reads column w-1
    right_ok = wcol < (W - 1)    # tap reads column w+1

    acc = jnp.zeros((HW, n), jnp.float32)
    for kh in range(3):
        for kw in range(3):
            start = kh * W + kw
            seg = x_ref[0, pl.ds(start, HW), :]
            if kw == 0:
                seg = jnp.where(left_ok, seg, jnp.zeros_like(seg))
            elif kw == 2:
                seg = jnp.where(right_ok, seg, jnp.zeros_like(seg))
            acc = acc + jnp.dot(seg, w_ref[kh, kw],
                                preferred_element_type=jnp.float32)
    y = acc * s_ref[...] + t_ref[...]
    o_ref[0] = jnp.maximum(y, 0.0).astype(o_ref.dtype)


def conv3x3_bn_relu(x_flat, w, scale, shift, *, H, W, out_dtype):
    B, L, Kp = x_flat.shape            # L = (H+2)*W + 2
    Np = w.shape[3]
    HW = H * W
    tn = _pick(Np, (256, 128))
    flops = 2 * B * HW * Kp * Np * 9
    bytes_accessed = int(B * L * Kp * x_flat.dtype.itemsize * (Np // tn)
                         + 9 * Kp * Np * w.dtype.itemsize
                         + B * HW * Np * jnp.dtype(out_dtype).itemsize)
    return pl.pallas_call(
        functools.partial(_conv3x3_bn_relu_kernel, H=H, W=W),
        out_shape=jax.ShapeDtypeStruct((B, HW, Np), out_dtype),
        grid=(B, Np // tn),
        in_specs=[
            pl.BlockSpec((1, L, Kp), lambda b, j: (b, 0, 0)),
            pl.BlockSpec((3, 3, Kp, tn), lambda b, j: (0, 0, 0, j)),
            pl.BlockSpec((1, tn), lambda b, j: (0, j)),
            pl.BlockSpec((1, tn), lambda b, j: (0, j)),
        ],
        out_specs=pl.BlockSpec((1, HW, tn), lambda b, j: (b, 0, j)),
        compiler_params=pltpu.CompilerParams(
            dimension_semantics=("parallel", "parallel"),
            vmem_limit_bytes=VMEM_LIMIT),
        cost_estimate=pl.CostEstimate(flops=flops, transcendentals=0,
                                      bytes_accessed=bytes_accessed),
    )(x_flat, w, scale, shift)


# ----------------------------------------------------------------------------
# Kernel 3: 1x1 conv + BN (no ReLU) with fused global-average-pool output.
# ----------------------------------------------------------------------------
def _conv1x1_bn_pool_kernel(x_ref, w_ref, s_ref, t_ref, o_ref, m_ref, *, inv_hw):
    y = jnp.dot(x_ref[0], w_ref[...], preferred_element_type=jnp.float32)
    y = y * s_ref[...] + t_ref[...]
    o_ref[0] = y.astype(o_ref.dtype)
    m_ref[0] = jnp.sum(y, axis=0, keepdims=True) * inv_hw


def conv1x1_bn_pool(x, w, scale, shift, *, out_dtype):
    B, HW, Kp = x.shape
    Np = w.shape[1]
    tn = _pick(Np, (256, 128))
    flops = 2 * B * HW * Kp * Np
    bytes_accessed = int(B * HW * Kp * x.dtype.itemsize * (Np // tn)
                         + Kp * Np * w.dtype.itemsize
                         + B * HW * Np * jnp.dtype(out_dtype).itemsize)
    return pl.pallas_call(
        functools.partial(_conv1x1_bn_pool_kernel, inv_hw=1.0 / HW),
        out_shape=(jax.ShapeDtypeStruct((B, HW, Np), out_dtype),
                   jax.ShapeDtypeStruct((B, 1, Np), jnp.float32)),
        grid=(B, Np // tn),
        in_specs=[
            pl.BlockSpec((1, HW, Kp), lambda b, j: (b, 0, 0)),
            pl.BlockSpec((Kp, tn), lambda b, j: (0, j)),
            pl.BlockSpec((1, tn), lambda b, j: (0, j)),
            pl.BlockSpec((1, tn), lambda b, j: (0, j)),
        ],
        out_specs=(pl.BlockSpec((1, HW, tn), lambda b, j: (b, 0, j)),
                   pl.BlockSpec((1, 1, tn), lambda b, j: (b, 0, j))),
        compiler_params=pltpu.CompilerParams(
            dimension_semantics=("parallel", "parallel"),
            vmem_limit_bytes=VMEM_LIMIT),
        cost_estimate=pl.CostEstimate(flops=flops, transcendentals=0,
                                      bytes_accessed=bytes_accessed),
    )(x, w, scale, shift)


# ----------------------------------------------------------------------------
# Kernel 4: SE gate (fc1 -> ReLU -> fc2 -> sigmoid), batched over B in one call.
# ----------------------------------------------------------------------------
def _se_gate_kernel(y_ref, w1_ref, b1_ref, w2_ref, b2_ref, g_ref, *, alpha):
    h = jnp.dot(y_ref[...], w1_ref[...], preferred_element_type=jnp.float32) + b1_ref[...]
    h = jnp.maximum(h, 0.0)
    s = jnp.dot(h, w2_ref[...], preferred_element_type=jnp.float32) + b2_ref[...]
    s = jax.nn.sigmoid(s)
    g_ref[...] = (alpha * s + (1.0 - alpha)).astype(g_ref.dtype)


def se_fc_gate(y, w1, b1, w2, b2, alpha):
    BP, C = y.shape
    Cr = w1.shape[1]
    return pl.pallas_call(
        functools.partial(_se_gate_kernel, alpha=float(alpha)),
        out_shape=jax.ShapeDtypeStruct((BP, C), jnp.float32),
        grid=(1,),
        in_specs=[
            pl.BlockSpec((BP, C), lambda i: (0, 0)),
            pl.BlockSpec((C, Cr), lambda i: (0, 0)),
            pl.BlockSpec((1, Cr), lambda i: (0, 0)),
            pl.BlockSpec((Cr, C), lambda i: (0, 0)),
            pl.BlockSpec((1, C), lambda i: (0, 0)),
        ],
        out_specs=pl.BlockSpec((BP, C), lambda i: (0, 0)),
        compiler_params=pltpu.CompilerParams(
            dimension_semantics=("arbitrary",),
            vmem_limit_bytes=VMEM_LIMIT),
    )(y, w1, b1, w2, b2)


# ----------------------------------------------------------------------------
# Kernel 5: channel gate * o3 + residual, then ReLU (row-tiled, lane-dense).
# ----------------------------------------------------------------------------
def _gate_residual_relu_kernel(x_ref, r_ref, g_ref, o_ref):
    y = x_ref[...].astype(jnp.float32) * g_ref[...] + r_ref[...]
    o_ref[...] = jnp.maximum(y, 0.0).astype(o_ref.dtype)


def gate_residual_relu(o3, res, gate):
    B, HW, C = o3.shape
    tm = _pick(HW, (512, 256, 128, 64, 32, 16, 8))
    return pl.pallas_call(
        _gate_residual_relu_kernel,
        out_shape=jax.ShapeDtypeStruct((B, HW, C), jnp.float32),
        grid=(B, HW // tm),
        in_specs=[
            pl.BlockSpec((1, tm, C), lambda b, t: (b, t, 0)),
            pl.BlockSpec((1, tm, C), lambda b, t: (b, t, 0)),
            pl.BlockSpec((1, 1, C), lambda b, t: (b, 0, 0)),
        ],
        out_specs=pl.BlockSpec((1, tm, C), lambda b, t: (b, t, 0)),
        compiler_params=pltpu.CompilerParams(
            dimension_semantics=("parallel", "parallel"),
            vmem_limit_bytes=VMEM_LIMIT),
    )(o3, res, gate)


# ----------------------------------------------------------------------------
# Forward wrapper (single NCHW<->NHWC conversion at entry/exit; channels-last,
# 128-padded lane layout everywhere in between).
# ----------------------------------------------------------------------------
def se_bottleneck_forward(x_nchw, params, alpha=0.0, compute_dtype=jnp.float32):
    B, Cin, H, W = x_nchw.shape
    planes = params["conv1_w"].shape[0]
    C4 = 4 * planes
    if Cin != C4:
        # TODO(synk): stride > 1 / downsample projection path is not implemented.
        raise NotImplementedError("identity residual requires inplanes == 4*planes")

    HW = H * W
    M = B * HW
    Cin_p = _round_up(Cin)
    Pp = _round_up(planes)
    C4p = _round_up(C4)
    Cr = params["fc1_w"].shape[0]
    Crp = _round_up(Cr)

    x_nhwc = jnp.transpose(x_nchw, (0, 2, 3, 1)).astype(jnp.float32)
    x_pad = jnp.pad(x_nhwc, ((0, 0), (0, 0), (0, 0), (0, Cin_p - Cin)))
    x_rows = x_pad.reshape(M, Cin_p)

    # --- conv1 (1x1) + bn1 + relu: tiled matmul kernel -----------------------
    w1 = params["conv1_w"][:, :, 0, 0].T                      # (Cin, planes)
    w1p = _pad2(w1, Cin_p, Pp).astype(compute_dtype)
    s1, t1 = fold_bn(params["bn1"])
    o1 = matmul_bn_act(x_rows.astype(compute_dtype), w1p,
                       _pad_row(s1, Pp), _pad_row(t1, Pp),
                       relu=True, out_dtype=compute_dtype)     # (M, Pp)

    # --- conv2 (3x3, stride 1, pad 1) + bn2 + relu: 9-tap in-kernel conv -----
    o1_img = o1.reshape(B, H, W, Pp)
    o1_hp = jnp.pad(o1_img, ((0, 0), (1, 1), (0, 0), (0, 0)))  # pad H only (halo)
    o1_flat = o1_hp.reshape(B, (H + 2) * W, Pp)
    o1_flat = jnp.pad(o1_flat, ((0, 0), (1, 1), (0, 0)))       # +1 row each end
    w2 = jnp.transpose(params["conv2_w"], (2, 3, 1, 0))        # (3,3,in,out)
    w2p = jnp.pad(w2, ((0, 0), (0, 0), (0, Pp - planes), (0, Pp - planes)))
    s2, t2 = fold_bn(params["bn2"])
    o2 = conv3x3_bn_relu(o1_flat, w2p.astype(compute_dtype),
                         _pad_row(s2, Pp), _pad_row(t2, Pp),
                         H=H, W=W, out_dtype=compute_dtype)    # (B, HW, Pp)

    # --- conv3 (1x1) + bn3 + fused global average pool -----------------------
    w3 = params["conv3_w"][:, :, 0, 0].T                       # (planes, C4)
    w3p = _pad2(w3, Pp, C4p).astype(compute_dtype)
    s3, t3 = fold_bn(params["bn3"])
    o3, y_mean = conv1x1_bn_pool(o2, w3p, _pad_row(s3, C4p), _pad_row(t3, C4p),
                                 out_dtype=compute_dtype)      # (B,HW,C4p), (B,1,C4p)

    # --- SE gate (batched fc1/fc2) --------------------------------------------
    fc1_w = _pad2(params["fc1_w"].T, C4p, Crp).astype(jnp.float32)
    fc1_b = _pad_row(params["fc1_b"], Crp)
    fc2_w = _pad2(params["fc2_w"].T, Crp, C4p).astype(jnp.float32)
    fc2_b = _pad_row(params["fc2_b"], C4p)
    BP = _round_up(B, 8)
    y2 = jnp.pad(y_mean.reshape(B, C4p), ((0, BP - B), (0, 0)))
    gate = se_fc_gate(y2, fc1_w, fc1_b, fc2_w, fc2_b, alpha)[:B].reshape(B, 1, C4p)

    # --- gate * o3 + residual, ReLU -------------------------------------------
    res = x_pad.reshape(B, HW, Cin_p)                          # Cin_p == C4p
    out = gate_residual_relu(o3, res, gate)                    # (B, HW, C4p) f32
    out = out.reshape(B, H, W, C4p)[..., :C4]
    return jnp.transpose(out, (0, 3, 1, 2))                    # back to NCHW


# ----------------------------------------------------------------------------
# Pure-JAX reference and parameter init (for correctness checking)
# ----------------------------------------------------------------------------
def ref_forward(x_nchw, params, alpha=0.0):
    x = jnp.transpose(x_nchw, (0, 2, 3, 1)).astype(jnp.float32)

    def bn(y, p):
        s, t = fold_bn(p)
        return y * s + t

    o1 = jnp.maximum(bn(x @ params["conv1_w"][:, :, 0, 0].T, params["bn1"]), 0.0)
    o2 = jax.lax.conv_general_dilated(
        o1, jnp.transpose(params["conv2_w"], (2, 3, 1, 0)), (1, 1), "SAME",
        dimension_numbers=("NHWC", "HWIO", "NHWC"))
    o2 = jnp.maximum(bn(o2, params["bn2"]), 0.0)
    o3 = bn(o2 @ params["conv3_w"][:, :, 0, 0].T, params["bn3"])
    y = jnp.mean(o3, axis=(1, 2))
    h = jnp.maximum(y @ params["fc1_w"].T + params["fc1_b"], 0.0)
    s = jax.nn.sigmoid(h @ params["fc2_w"].T + params["fc2_b"])
    gate = alpha * s + (1.0 - alpha)
    out = jnp.maximum(o3 * gate[:, None, None, :] + x, 0.0)
    return jnp.transpose(out, (0, 3, 1, 2))


def init_params(key, inplanes, planes, reduction=16):
    c4 = planes * 4
    keys = jax.random.split(key, 12)

    def bn_params(k, c):
        k1, k2, k3, k4 = jax.random.split(k, 4)
        gamma = jax.random.uniform(k1, (c,), jnp.float32, 0.5, 1.5)
        beta = 0.1 * jax.random.normal(k2, (c,), jnp.float32)
        mean = 0.1 * jax.random.normal(k3, (c,), jnp.float32)
        var = jax.random.uniform(k4, (c,), jnp.float32, 0.5, 1.5)
        return (gamma, beta, mean, var)

    return {
        "conv1_w": 0.2 * jax.random.normal(keys[0], (planes, inplanes, 1, 1), jnp.float32),
        "bn1": bn_params(keys[1], planes),
        "conv2_w": 0.2 * jax.random.normal(keys[2], (planes, planes, 3, 3), jnp.float32),
        "bn2": bn_params(keys[3], planes),
        "conv3_w": 0.2 * jax.random.normal(keys[4], (c4, planes, 1, 1), jnp.float32),
        "bn3": bn_params(keys[5], c4),
        "fc1_w": 0.2 * jax.random.normal(keys[6], (c4 // reduction, c4), jnp.float32),
        "fc1_b": 0.1 * jax.random.normal(keys[7], (c4 // reduction,), jnp.float32),
        "fc2_w": 0.2 * jax.random.normal(keys[8], (c4, c4 // reduction), jnp.float32),
        "fc2_b": 0.1 * jax.random.normal(keys[9], (c4,), jnp.float32),
    }


if __name__ == "__main__":
    # Small shapes: inplanes == planes * expansion so the identity residual path is valid.
    B, planes, H, W = 2, 4, 8, 8
    inplanes = planes * 4                     # 16
    reduction = 16

    key = jax.random.PRNGKey(0)
    kx, kp = jax.random.split(key)
    x = jax.random.normal(kx, (B, inplanes, H, W), jnp.float32)
    params = init_params(kp, inplanes, planes, reduction)

    # Module default: SEBottleneck builds SELayer with alpha=0.0.
    out = jax.block_until_ready(se_bottleneck_forward(x, params, alpha=0.0))
    ref = jax.block_until_ready(ref_forward(x, params, alpha=0.0))
    assert out.shape == (B, planes * 4, H, W)
    assert jnp.allclose(out, ref, rtol=1e-3, atol=1e-3), "mismatch (alpha=0.0, f32)"

    # Exercise the SE sigmoid / fc path numerically.
    out1 = jax.block_until_ready(se_bottleneck_forward(x, params, alpha=1.0))
    ref1 = jax.block_until_ready(ref_forward(x, params, alpha=1.0))
    assert jnp.allclose(out1, ref1, rtol=1e-3, atol=1e-3), "mismatch (alpha=1.0, f32)"

    # bf16 MXU inputs (f32 accumulation + f32 epilogues); looser tolerance vs f32 ref.
    out_bf = jax.block_until_ready(
        se_bottleneck_forward(x, params, alpha=1.0, compute_dtype=jnp.bfloat16))
    assert jnp.allclose(out_bf, ref1, rtol=1e-1, atol=1e-1), "mismatch (alpha=1.0, bf16)"

    print("KERNEL_OK")
</pallas_src>

<mosaic_0001>
module attributes {stable_mosaic.version = 11 : i64} {
  func.func @_matmul_bn_act_kernel(%arg0: i32, %arg1: i32, %arg2: i32, %arg3: memref<128x128xf32, #tpu.memory_space<vmem>>, %arg4: memref<128x128xf32, #tpu.memory_space<vmem>>, %arg5: memref<1x128xf32, #tpu.memory_space<vmem>>, %arg6: memref<1x128xf32, #tpu.memory_space<vmem>>, %arg7: memref<128x128xf32, #tpu.memory_space<vmem>>, %arg8: memref<128x128xf32, #tpu.memory_space<vmem>>) attributes {dimension_semantics = [#tpu.dimension_semantics<parallel>, #tpu.dimension_semantics<parallel>, #tpu.dimension_semantics<arbitrary>], iteration_bounds = array<i64: 1, 1, 1>, scalar_prefetch = 0 : i64, scratch_operands = 1 : i64, tpu.core_type = #tpu.core_type<tc>, window_params = [{transform_indices = @transform_0, window_bounds = array<i64: 128, 128>}, {transform_indices = @transform_1, window_bounds = array<i64: 128, 128>}, {transform_indices = @transform_2, window_bounds = array<i64: 1, 128>}, {transform_indices = @transform_3, window_bounds = array<i64: 1, 128>}, {transform_indices = @transform_4, window_bounds = array<i64: 128, 128>}]} {
    %c0_i32 = arith.constant 0 : i32
    %0 = arith.cmpi eq, %arg2, %c0_i32 : i32
    %1 = arith.extui %0 : i1 to i32
    %c0_i32_0 = arith.constant 0 : i32
    %2 = arith.cmpi ne, %1, %c0_i32_0 : i32
    scf.if %2 {
      %cst_10 = arith.constant 0.000000e+00 : f32
      %12 = vector.broadcast %cst_10 : f32 to vector<128x128xf32>
      %c0_11 = arith.constant 0 : index
      %c0_12 = arith.constant 0 : index
      %13 = vector.load %arg8[%c0_11, %c0_12] : memref<128x128xf32, #tpu.memory_space<vmem>>, vector<128x128xf32>
      tpu.vector_store %arg8[%c0_11, %c0_12], %12 {strides = array<i32>} : memref<128x128xf32, #tpu.memory_space<vmem>>, vector<128x128xf32>,
    } else {
    }
    %c0 = arith.constant 0 : index
    %c0_1 = arith.constant 0 : index
    %3 = vector.load %arg8[%c0, %c0_1] : memref<128x128xf32, #tpu.memory_space<vmem>>, vector<128x128xf32>
    %c0_2 = arith.constant 0 : index
    %c0_3 = arith.constant 0 : index
    %4 = vector.load %arg3[%c0_2, %c0_3] : memref<128x128xf32, #tpu.memory_space<vmem>>, vector<128x128xf32>
    %c0_4 = arith.constant 0 : index
    %c0_5 = arith.constant 0 : index
    %5 = vector.load %arg4[%c0_4, %c0_5] : memref<128x128xf32, #tpu.memory_space<vmem>>, vector<128x128xf32>
    %cst = arith.constant dense<0.000000e+00> : vector<128x128xf32>
    %6 = tpu.matmul %4, %5, %cst {dimension_numbers = #tpu.dot_dimension_numbers<[1], [0], [0], [1], [0, 0, 1, 1], [], []>} : vector<128x128xf32>, vector<128x128xf32>, vector<128x128xf32> -> vector<128x128xf32>
    %7 = arith.addf %3, %6 : vector<128x128xf32>
    %c0_6 = arith.constant 0 : index
    %c0_7 = arith.constant 0 : index
    %8 = vector.load %arg8[%c0_6, %c0_7] : memref<128x128xf32, #tpu.memory_space<vmem>>, vector<128x128xf32>
    tpu.vector_store %arg8[%c0_6, %c0_7], %7 {strides = array<i32>} : memref<128x128xf32, #tpu.memory_space<vmem>>, vector<128x128xf32>,
    %c0_i32_8 = arith.constant 0 : i32
    %9 = arith.cmpi eq, %arg2, %c0_i32_8 : i32
    %10 = arith.extui %9 : i1 to i32
    %c0_i32_9 = arith.constant 0 : i32
    %11 = arith.cmpi ne, %10, %c0_i32_9 : i32
    scf.if %11 {
      %c0_10 = arith.constant 0 : index
      %c0_11 = arith.constant 0 : index
      %12 = vector.load %arg8[%c0_10, %c0_11] : memref<128x128xf32, #tpu.memory_space<vmem>>, vector<128x128xf32>
      %c0_12 = arith.constant 0 : index
      %c0_13 = arith.constant 0 : index
      %13 = vector.load %arg5[%c0_12, %c0_13] : memref<1x128xf32, #tpu.memory_space<vmem>>, vector<1x128xf32>
      %14 = vector.broadcast %13 : vector<1x128xf32> to vector<128x128xf32>
      %15 = arith.mulf %12, %14 : vector<128x128xf32>
      %c0_14 = arith.constant 0 : index
      %c0_15 = arith.constant 0 : index
      %16 = vector.load %arg6[%c0_14, %c0_15] : memref<1x128xf32, #tpu.memory_space<vmem>>, vector<1x128xf32>
      %17 = vector.broadcast %16 : vector<1x128xf32> to vector<128x128xf32>
      %18 = arith.addf %15, %17 : vector<128x128xf32>
      %cst_16 = arith.constant 0.000000e+00 : f32
      %19 = vector.broadcast %cst_16 : f32 to vector<128x128xf32>
      %20 = arith.maximumf %18, %19 : vector<128x128xf32>
      %c0_17 = arith.constant 0 : index
      %c0_18 = arith.constant 0 : index
      %21 = vector.load %arg7[%c0_17, %c0_18] : memref<128x128xf32, #tpu.memory_space<vmem>>, vector<128x128xf32>
      tpu.vector_store %arg7[%c0_17, %c0_18], %20 {strides = array<i32>} : memref<128x128xf32, #tpu.memory_space<vmem>>, vector<128x128xf32>,
    } else {
    }
    return
  }
  func.func @transform_0(%arg0: i32, %arg1: i32, %arg2: i32) -> (i32, i32) {
    %c0_i32 = arith.constant 0 : i32
    return %arg0, %arg2 : i32, i32
  }
  func.func @transform_1(%arg0: i32, %arg1: i32, %arg2: i32) -> (i32, i32) {
    %c0_i32 = arith.constant 0 : i32
    return %arg2, %arg1 : i32, i32
  }
  func.func @transform_2(%arg0: i32, %arg1: i32, %arg2: i32) -> (i32, i32) {
    %c0_i32 = arith.constant 0 : i32
    %c0_i32_0 = arith.constant 0 : i32
    return %c0_i32, %arg1 : i32, i32
  }
  func.func @transform_3(%arg0: i32, %arg1: i32, %arg2: i32) -> (i32, i32) {
    %c0_i32 = arith.constant 0 : i32
    %c0_i32_0 = arith.constant 0 : i32
    return %c0_i32, %arg1 : i32, i32
  }
  func.func @transform_4(%arg0: i32, %arg1: i32, %arg2: i32) -> (i32, i32) {
    %c0_i32 = arith.constant 0 : i32
    return %arg0, %arg1 : i32, i32
  }
}

</mosaic_0001>

<bundles_post_ra>
// kernel: tpu_custom_call.1
= control target key start
LH: loop header
LB: loop body
LE: loop exit
PB: predicated region body
PF: predicated region fallthrough
CT: control target
= control target key end

     0   :  { %9 = vsyncpa [#allocation4], 0  ;;  %s738_s0 = inlined_call_operand.hbm [shape: f32[128,128], index: 0, kind: input, shape index: {}]   ;;  %s739_s1 = inlined_call_operand.hbm [shape: f32[128,128], index: 1, kind: input, shape index: {}]   ;;  %s740_s2 = inlined_call_operand.vmem [shape: f32[1,128], index: 2, kind: input, shape index: {}]   ;;  %s741_s3 = inlined_call_operand.vmem [shape: f32[1,128], index: 3, kind: input, shape index: {}]   ;;  %s742_s4 = inlined_call_operand.hbm [shape: f32[128,128], index: 4, kind: output, shape index: {}]  }
   0x1   :  { %10 = vsyncpa [#allocation7], 0 }
   0x2   :  { %11 = vsyncpa [#allocation5], 0  ;;  %s621_s15 = smov [#allocation3]   ;;  %s549_s19 = scalar_lea.hbm %s738_s0, 2048 }
   0x3   :  { %s17_s16 = sshll.u32 %s621_s15, 4  ;;  %p550_p0 = scmp.ne.s32.totalorder %s738_s0, %s549_s19  ;;  %s18_s16 = int_to_ptr.vmem [resolvable:$true] %s17_s16 }
   0x4   :  { %p553_p1 = scmp.lt.u32.totalorder %s549_s19, %s738_s0 }
   0x6   :  { %p555_p2 = pnand %p553_p1, %p550_p0 }
   0x8   :  { %558 = shalt.err (!%p555_p2)
}
   0x9   :  { %s559_s24 = scalar_lea.vmem %s18_s16, 2048  ;;  %p564_p4 = scmp.lt.s32.totalorder %s18_s16, %s18_s16 }
   0xa   :  { %p560_p3 = scmp.ne.s32.totalorder %s18_s16, %s559_s24  ;;  %p565_p5 = scmp.lt.s32.totalorder %s559_s24, %s559_s24 }
   0xc   :  { %p566_p6 = por %p565_p5, %p564_p4 }
   0xe   :  { %p567_p7 = pnand %p566_p6, %p560_p3 }
  0x10   :  { %570 = shalt.err (!%p567_p7)
}
  0x11   :  { %s622_s25 = smov 128   ;;  %s623_s26 = smov 8  }
  0x12   :  { %23 = dma.hbm_to_vmem [thread:$0]  %s738_s0, 2048, %s18_s16, [#allocation4], %s622_s25, %s622_s25, %s623_s26  }
  0x13   :  { %s624_s29 = smov [#allocation6]   ;;  %s571_s7 = scalar_lea.hbm %s739_s1, 2048 }
  0x14   :  { %s29_s30 = sshll.u32 %s624_s29, 4  ;;  %p572_p8 = scmp.ne.s32.totalorder %s739_s1, %s571_s7  ;;  %s30_s30 = int_to_ptr.vmem [resolvable:$true] %s29_s30 }
  0x15   :  { %p575_p9 = scmp.lt.u32.totalorder %s571_s7, %s739_s1 }
  0x17   :  { %p577_p10 = pnand %p575_p9, %p572_p8 }
  0x19   :  { %580 = shalt.err (!%p577_p10)
}
  0x1a   :  { %s581_s12 = scalar_lea.vmem %s30_s30, 2048  ;;  %p586_p12 = scmp.lt.s32.totalorder %s30_s30, %s30_s30 }
  0x1b   :  { %p582_p11 = scmp.ne.s32.totalorder %s30_s30, %s581_s12  ;;  %p587_p13 = scmp.lt.s32.totalorder %s581_s12, %s581_s12 }
  0x1d   :  { %p588_p0 = por %p587_p13, %p586_p12 }
  0x1f   :  { %p589_p1 = pnand %p588_p0, %p582_p11 }
  0x21   :  { %592 = shalt.err (!%p589_p1)
}
  0x22   :  { %35 = dma.hbm_to_vmem [thread:$0]  %s739_s1, 2048, %s30_s30, [#allocation7], %s622_s25, %s622_s25, %s623_s26  }
  0x23   :  { %615 = dma.done.wait [#allocation4], 2048  }
  0x24   :  { %616 = vsyncadd [#allocation4], 4294965248 }
  0x25   :  { %617 = dma.done.wait [#allocation7], 2048  }
  0x26   :  { %618 = vsyncadd [#allocation7], 4294965248  ;;  %v98_v0 = vld [vmem:[#allocation6] sm:$0xff]  ;;  %v99_v1 = vld [vmem:[#allocation6 + $0x8] sm:$0xff] }
  0x27   :  { %v100_v2 = vld [vmem:[#allocation6 + $0x10] sm:$0xff]  ;;  %v496_v3 = vpack.c.bf16 %v99_v1, %v98_v0  ;;  %v101_v4 = vld [vmem:[#allocation6 + $0x18] sm:$0xff]  ;;  %v102_v6 = vld [vmem:[#allocation6 + $0x20] sm:$0xff] }
  0x28   :  { %v500_v5 = vpack.c.bf16 %v101_v4, %v100_v2  ;;  %v103_v7 = vld [vmem:[#allocation6 + $0x28] sm:$0xff]  ;;  %v82_v9 = vld [vmem:[#allocation3] sm:$0xff]  ;;  %v104_v11 = vld [vmem:[#allocation6 + $0x30] sm:$0xff] }
  0x29   :  { %497 = vmatprep.subr.bf16.mxu0 %v496_v3  ;;  %528 = vmatprep.subr.bf16.mxu1 %v496_v3  ;;  %v504_v8 = vpack.c.bf16 %v103_v7, %v102_v6  ;;  %v90_v10 = vld [vmem:[#allocation3 + $0x40] sm:$0xff]  ;;  %v105_v12 = vld [vmem:[#allocation6 + $0x38] sm:$0xff]  ;;  %v107_v15 = vld [vmem:[#allocation6 + $0x48] sm:$0xff] }
  0x2a   :  { %499 = vmatpush3.bf16.msra.mxu0 %v496_v3  ;;  %536 = vmatpush3.bf16.msra.mxu1 %v496_v3  ;;  %v508_v13 = vpack.c.bf16 %v105_v12, %v104_v11  ;;  %v106_v14 = vld [vmem:[#allocation6 + $0x40] sm:$0xff]  ;;  %v108_v17 = vld [vmem:[#allocation6 + $0x50] sm:$0xff]  ;;  %v109_v18 = vld [vmem:[#allocation6 + $0x58] sm:$0xff] }
  0x2b   :  { %501 = vmatprep.subr.bf16.mxu0 %v500_v5  ;;  %529 = vmatprep.subr.bf16.mxu1 %v500_v5  ;;  %v512_v16 = vpack.c.bf16 %v107_v15, %v106_v14  ;;  %v516_v19 = vpack.c.bf16 %v109_v18, %v108_v17  ;;  %v110_v20 = vld [vmem:[#allocation6 + $0x60] sm:$0xff]  ;;  %v111_v21 = vld [vmem:[#allocation6 + $0x68] sm:$0xff]  ;;  %v112_v23 = vld [vmem:[#allocation6 + $0x70] sm:$0xff] }
  0x2c   :  { %472 = vmatprep.mubr.f32.mxu0 %v82_v9  ;;  %484 = vmatprep.mubr.f32.mxu1 %v90_v10  ;;  %v520_v22 = vpack.c.bf16 %v111_v21, %v110_v20  ;;  %v113_v24 = vld [vmem:[#allocation6 + $0x78] sm:$0xff]  ;;  %v83_v26 = vld [vmem:[#allocation3 + $0x8] sm:$0xff]  ;;  %v84_v28 = vld [vmem:[#allocation3 + $0x10] sm:$0xff] }
  0x2d   :  { %v524_v25 = vpack.c.bf16 %v113_v24, %v112_v23  ;;  %v91_v27 = vld [vmem:[#allocation3 + $0x48] sm:$0xff]  ;;  %v92_v29 = vld [vmem:[#allocation3 + $0x50] sm:$0xff]  ;;  %v85_v30 = vld [vmem:[#allocation3 + $0x18] sm:$0xff] }
  0x2e   :  { %503 = vmatpush3.bf16.msra.mxu0 %v500_v5  ;;  %537 = vmatpush3.bf16.msra.mxu1 %v500_v5  ;;  %v93_v31 = vld [vmem:[#allocation3 + $0x58] sm:$0xff]  ;;  %v86_v32 = vld [vmem:[#allocation3 + $0x20] sm:$0xff]  ;;  %v87_v34 = vld [vmem:[#allocation3 + $0x28] sm:$0xff] }
  0x2f   :  { %505 = vmatprep.subr.bf16.mxu0 %v504_v8  ;;  %530 = vmatprep.subr.bf16.mxu1 %v504_v8  ;;  %v94_v33 = vld [vmem:[#allocation3 + $0x60] sm:$0xff]  ;;  %v95_v35 = vld [vmem:[#allocation3 + $0x68] sm:$0xff]  ;;  %v88_v36 = vld [vmem:[#allocation3 + $0x30] sm:$0xff] }
  0x30   :  { %v96_v37 = vld [vmem:[#allocation3 + $0x70] sm:$0xff]  ;;  %v89_v38 = vld [vmem:[#allocation3 + $0x38] sm:$0xff]  ;;  %v684_v40 = vld [vmem:[%s740_s2] ss:$0 sm:$0xff]  ;;  %s625_s2 = smov [#allocation8]  }
  0x31   :  { %v97_v39 = vld [vmem:[#allocation3 + $0x78] sm:$0xff]  ;;  %v689_v42 = vld [vmem:[%s741_s3] ss:$0 sm:$0xff]  ;;  %s393_s3 = sshll.u32 %s625_s2, 4  ;;  %s394_s3 = int_to_ptr.vmem [resolvable:$true] %s393_s3 }
  0x32   :  { %507 = vmatpush3.bf16.msra.mxu0 %v504_v8  ;;  %538 = vmatpush3.bf16.msra.mxu1 %v504_v8  ;;  %s593_s17 = scalar_lea.vmem %s394_s3, 2048  ;;  %p598_p3 = scmp.lt.s32.totalorder %s394_s3, %s394_s3 }
  0x33   :  { %509 = vmatprep.subr.bf16.mxu0 %v508_v13  ;;  %531 = vmatprep.subr.bf16.mxu1 %v508_v13  ;;  %p594_p2 = scmp.ne.s32.totalorder %s394_s3, %s593_s17  ;;  %p599_p4 = scmp.lt.s32.totalorder %s593_s17, %s593_s17 }
  0x35   :  { %p600_p5 = por %p599_p4, %p598_p3 }
  0x36   :  { %511 = vmatpush3.bf16.msra.mxu0 %v508_v13  ;;  %539 = vmatpush3.bf16.msra.mxu1 %v508_v13 }
  0x37   :  { %513 = vmatprep.subr.bf16.mxu0 %v512_v16  ;;  %532 = vmatprep.subr.bf16.mxu1 %v512_v16  ;;  %p601_p6 = pnand %p600_p5, %p594_p2 }
  0x3a   :  { %515 = vmatpush3.bf16.msra.mxu0 %v512_v16  ;;  %540 = vmatpush3.bf16.msra.mxu1 %v512_v16 }
  0x3b   :  { %517 = vmatprep.subr.bf16.mxu0 %v516_v19  ;;  %533 = vmatprep.subr.bf16.mxu1 %v516_v19 }
  0x3e   :  { %519 = vmatpush3.bf16.msra.mxu0 %v516_v19  ;;  %541 = vmatpush3.bf16.msra.mxu1 %v516_v19 }
  0x3f   :  { %521 = vmatprep.subr.bf16.mxu0 %v520_v22  ;;  %534 = vmatprep.subr.bf16.mxu1 %v520_v22 }
  0x42   :  { %523 = vmatpush3.bf16.msra.mxu0 %v520_v22  ;;  %542 = vmatpush3.bf16.msra.mxu1 %v520_v22 }
  0x43   :  { %525 = vmatprep.subr.bf16.mxu0 %v524_v25  ;;  %535 = vmatprep.subr.bf16.mxu1 %v524_v25 }
  0x46   :  { %527 = vmatpush3.bf16.msra.mxu0 %v524_v25  ;;  %543 = vmatpush3.bf16.msra.mxu1 %v524_v25 }
  0x49   :  { %473 = vmatmul.mubr.f32.vlgmr.msra.gmra.mrb[0].mxu0 %v83_v26  ;;  %485 = vmatmul.mubr.f32.vlgmr.msra.gmra.mrb[0].mxu1 %v91_v27 }
  0x4a   :  { %475 = vmatprep.mubr.f32.mxu0 %v84_v28  ;;  %487 = vmatprep.mubr.f32.mxu1 %v92_v29 }
  0x4d   :  { %476 = vmatmul.mubr.f32.gmra.mrb[2].mxu0 %v85_v30  ;;  %488 = vmatmul.mubr.f32.gmra.mrb[2].mxu1 %v93_v31 }
  0x4e   :  { %478 = vmatprep.mubr.f32.mxu0 %v86_v32  ;;  %490 = vmatprep.mubr.f32.mxu1 %v94_v33 }
  0x51   :  { %479 = vmatmul.mubr.f32.gmra.mrb[4].mxu0 %v87_v34  ;;  %491 = vmatmul.mubr.f32.gmra.mrb[4].mxu1 %v95_v35 }
  0x52   :  { %481 = vmatprep.mubr.f32.mxu0 %v88_v36  ;;  %493 = vmatprep.mubr.f32.mxu1 %v96_v37 }
  0x55   :  { %482 = vmatmul.mubr.f32.gmra.mrb[6].mxu0 %v89_v38  ;;  %494 = vmatmul.mubr.f32.gmra.mrb[6].mxu1 %v97_v39 }
 0x11c   :  { %v474_v41 = vpop.f32.mrb[0].mxu0  ;;  %v486_v43 = vpop.f32.mrb[0].mxu1 }
 0x11d   :  { %v318_v44 = vmul.f32 %v474_v41, %v684_v40  ;;  %v326_v45 = vmul.f32 %v486_v43, %v684_v40  ;;  %v180_v46 = vpop.f32.mrb[1].mxu0  ;;  %v220_v47 = vpop.f32.mrb[1].mxu1 }
 0x11e   :  { %v317_v48 = vmul.f32 %v684_v40, %v180_v46  ;;  %v325_v49 = vmul.f32 %v684_v40, %v220_v47 }
 0x11f   :  { %v341_v50 = vadd.f32 %v689_v42, %v318_v44  ;;  %v349_v51 = vadd.f32 %v689_v42, %v326_v45 }
 0x120   :  { %v340_v52 = vadd.f32 %v689_v42, %v317_v48  ;;  %v348_v53 = vadd.f32 %v689_v42, %v325_v49  ;;  %v477_v54 = vpop.f32.mrb[2].mxu0  ;;  %v489_v55 = vpop.f32.mrb[2].mxu1 }
 0x121   :  { %v357_v56 = vmax.f32 %v341_v50, 0.0  ;;  %v365_v57 = vmax.f32 %v349_v51, 0.0  ;;  %v320_v58 = vmul.f32 %v477_v54, %v684_v40  ;;  %v328_v59 = vmul.f32 %v489_v55, %v684_v40  ;;  %v190_v60 = vpop.f32.mrb[3].mxu0  ;;  %v230_v61 = vpop.f32.mrb[3].mxu1 }
 0x122   :  { %v356_v62 = vmax.f32 %v340_v52, 0.0  ;;  %v364_v63 = vmax.f32 %v348_v53, 0.0  ;;  %v319_v0 = vmul.f32 %v684_v40, %v190_v60  ;;  %v327_v1 = vmul.f32 %v684_v40, %v230_v61 }
 0x123   :  { %373 = vst [vmem:[#allocation8 + $0x8] sm:$0xff] %v357_v56  ;;  %381 = vst [vmem:[#allocation8 + $0x48] sm:$0xff] %v365_v57  ;;  %v343_v2 = vadd.f32 %v689_v42, %v320_v58  ;;  %v351_v3 = vadd.f32 %v689_v42, %v328_v59 }
 0x124   :  { %372 = vst [vmem:[#allocation8] sm:$0xff] %v356_v62  ;;  %380 = vst [vmem:[#allocation8 + $0x40] sm:$0xff] %v364_v63  ;;  %v342_v4 = vadd.f32 %v689_v42, %v319_v0  ;;  %v350_v5 = vadd.f32 %v689_v42, %v327_v1  ;;  %v480_v6 = vpop.f32.mrb[4].mxu0  ;;  %v492_v7 = vpop.f32.mrb[4].mxu1 }
 0x125   :  { %v359_v8 = vmax.f32 %v343_v2, 0.0  ;;  %v367_v9 = vmax.f32 %v351_v3, 0.0  ;;  %v322_v10 = vmul.f32 %v480_v6, %v684_v40  ;;  %v330_v11 = vmul.f32 %v492_v7, %v684_v40  ;;  %v200_v12 = vpop.f32.mrb[5].mxu0  ;;  %v240_v13 = vpop.f32.mrb[5].mxu1 }
 0x126   :  { %v358_v14 = vmax.f32 %v342_v4, 0.0  ;;  %v366_v15 = vmax.f32 %v350_v5, 0.0  ;;  %v321_v16 = vmul.f32 %v684_v40, %v200_v12  ;;  %v329_v17 = vmul.f32 %v684_v40, %v240_v13 }
 0x127   :  { %375 = vst [vmem:[#allocation8 + $0x18] sm:$0xff] %v359_v8  ;;  %383 = vst [vmem:[#allocation8 + $0x58] sm:$0xff] %v367_v9  ;;  %v345_v18 = vadd.f32 %v689_v42, %v322_v10  ;;  %v353_v19 = vadd.f32 %v689_v42, %v330_v11 }
 0x128   :  { %374 = vst [vmem:[#allocation8 + $0x10] sm:$0xff] %v358_v14  ;;  %382 = vst [vmem:[#allocation8 + $0x50] sm:$0xff] %v366_v15  ;;  %v344_v20 = vadd.f32 %v689_v42, %v321_v16  ;;  %v352_v21 = vadd.f32 %v689_v42, %v329_v17  ;;  %v483_v22 = vpop.f32.mrb[6].mxu0  ;;  %v495_v23 = vpop.f32.mrb[6].mxu1 }
 0x129   :  { %v361_v24 = vmax.f32 %v345_v18, 0.0  ;;  %v369_v25 = vmax.f32 %v353_v19, 0.0  ;;  %v324_v26 = vmul.f32 %v483_v22, %v684_v40  ;;  %v332_v27 = vmul.f32 %v495_v23, %v684_v40  ;;  %v210_v28 = vpop.f32.mrb[7].mxu0  ;;  %v250_v29 = vpop.f32.mrb[7].mxu1 }
 0x12a   :  { %v360_v30 = vmax.f32 %v344_v20, 0.0  ;;  %v368_v31 = vmax.f32 %v352_v21, 0.0  ;;  %v323_v32 = vmul.f32 %v684_v40, %v210_v28  ;;  %v331_v33 = vmul.f32 %v684_v40, %v250_v29 }
 0x12b   :  { %377 = vst [vmem:[#allocation8 + $0x28] sm:$0xff] %v361_v24  ;;  %385 = vst [vmem:[#allocation8 + $0x68] sm:$0xff] %v369_v25  ;;  %v347_v34 = vadd.f32 %v689_v42, %v324_v26  ;;  %v355_v35 = vadd.f32 %v689_v42, %v332_v27 }
 0x12c   :  { %376 = vst [vmem:[#allocation8 + $0x20] sm:$0xff] %v360_v30  ;;  %384 = vst [vmem:[#allocation8 + $0x60] sm:$0xff] %v368_v31  ;;  %v346_v36 = vadd.f32 %v689_v42, %v323_v32  ;;  %v354_v37 = vadd.f32 %v689_v42, %v331_v33 }
 0x12d   :  { %v363_v38 = vmax.f32 %v347_v34, 0.0  ;;  %v371_v39 = vmax.f32 %v355_v35, 0.0 }
 0x12e   :  { %v362_v41 = vmax.f32 %v346_v36, 0.0  ;;  %v370_v43 = vmax.f32 %v354_v37, 0.0 }
 0x12f   :  { %379 = vst [vmem:[#allocation8 + $0x38] sm:$0xff] %v363_v38  ;;  %387 = vst [vmem:[#allocation8 + $0x78] sm:$0xff] %v371_v39 }
 0x130   :  { %378 = vst [vmem:[#allocation8 + $0x30] sm:$0xff] %v362_v41  ;;  %386 = vst [vmem:[#allocation8 + $0x70] sm:$0xff] %v370_v43 }
 0x131   :  { %604 = shalt.err (!%p601_p6)
}
 0x132   :  { %s605_s20 = scalar_lea.hbm %s742_s4, 2048 }
 0x133   :  { %p606_p7 = scmp.ne.s32.totalorder %s742_s4, %s605_s20  ;;  %p609_p8 = scmp.lt.u32.totalorder %s605_s20, %s742_s4 }
 0x135   :  { %p611_p9 = pnand %p609_p8, %p606_p7 }
 0x137   :  { %614 = shalt.err (!%p611_p9)
}
 0x138   :  { %399 = dma.vmem_to_hbm [thread:$0]  %s394_s3, 2048, %s742_s4, [#allocation5], %s622_s25, %s622_s25, %s623_s26  }
 0x139   :  { %619 = dma.done.wait [#allocation5], 2048  }
 0x13a   :  { %620 = vsyncadd [#allocation5], 4294965248 }
 0x13b   :  { %403 = vsyncpa [#allocation4], 1 }
 0x13c   :  { %404 = vsyncpa [#allocation7], 1 }
 0x13d   :  { %405 = vsyncpa [#allocation5], 1 }

</bundles_post_ra>
